<compile_context>
chip_gen: v5e
topology: v5e:2x2
jax: 0.10.0
libtpu: 0.0.40
codegen_flags: <defaults>
</compile_context>

<pallas_src>
import functools

import jax
import jax.numpy as jnp
from jax.experimental import pallas as pl
from jax.experimental.pallas import tpu as pltpu


def _round_up(n, m):
    return ((n + m - 1) // m) * m


def _ae_kernel(x_ref, w0_ref, b0_ref, w1_ref, b1_ref,
               w2_ref, b2_ref, w3_ref, b3_ref, out_ref):
    cdt = w0_ref.dtype                      # MXU operand dtype (f32 or bf16)
    x = x_ref[...]

    # hid_0: pre-activation kept in f32 for the residual add.
    h0 = jnp.dot(x, w0_ref[...], preferred_element_type=jnp.float32) + b0_ref[...]

    # hid_1 + ReLU (+ dropout with rate 0.0 == identity)
    g = jnp.dot(h0.astype(cdt), w1_ref[...],
                preferred_element_type=jnp.float32) + b1_ref[...]
    g = jnp.maximum(g, 0.0)

    # hid_2 + ReLU
    g = jnp.dot(g.astype(cdt), w2_ref[...],
                preferred_element_type=jnp.float32) + b2_ref[...]
    g = jnp.maximum(g, 0.0)

    # residual add with pre-activation hid_0
    g = g + h0

    # out + ReLU
    g = jnp.dot(g.astype(cdt), w3_ref[...],
                preferred_element_type=jnp.float32) + b3_ref[...]
    out_ref[...] = jnp.maximum(g, 0.0).astype(out_ref.dtype)


def prepare_params(params, *, compute_dtype=jnp.float32):
    """One-time parameter prep (call once, outside the per-step forward).

    Weights are cast to `compute_dtype` (bf16 halves their VMEM/HBM footprint
    and uses the native MXU dtype on all generations; accuracy tradeoff).
    Biases stay f32 (they are added to the f32 accumulator).
    """
    prepped = {}
    for i in range(4):
        prepped[f"w{i}"] = params[f"w{i}"].astype(compute_dtype)
        prepped[f"b{i}"] = params[f"b{i}"].astype(jnp.float32)
    return prepped


def genres_ae_forward(x, params, *, tile_b=512,
                      vmem_budget_bytes=48 * 1024 * 1024):
    """x: (batch, genre_size). params: dict w0..w3 (in,out), b0..b3 (1,out)."""
    batch, genre_size = x.shape
    hid = params["w0"].shape[1]
    hid2 = params["w1"].shape[1]
    compute_dtype = params["w0"].dtype
    itemsize = jnp.dtype(compute_dtype).itemsize

    if x.dtype != compute_dtype:
        x = x.astype(compute_dtype)

    # ---------------- VMEM budgeting (explicit, v7x-safe) ----------------
    # Resident weights/biases are double-buffered by the Pallas pipeline.
    w_elems = genre_size * hid + hid * hid2 + hid2 * hid + hid * genre_size
    b_elems = 2 * hid + hid2 + genre_size
    resident_bytes = 2 * (w_elems * itemsize + b_elems * 4)

    # Per-step footprint estimate uses lane/sublane-padded dims (compiler pads
    # vregs/VMEM tiles to (8,128) internally even if we do not pad arrays).
    Gp = _round_up(genre_size, 128)
    Hp = _round_up(hid, 128)
    H2p = _round_up(hid2, 128)

    def per_step_bytes(tb):
        tbp = _round_up(tb, 8)
        io = 2 * tbp * Gp * itemsize + 2 * tbp * Gp * 4      # x + out (double-buffered)
        inter = 4 * tbp * (2 * Hp + H2p + Gp)                # f32 intermediates (generous)
        return io + inter

    if resident_bytes + per_step_bytes(8) > vmem_budget_bytes:
        # TODO(synk): add a K/N-tiled fallback with an f32 accumulator for
        # weight sets that no longer fit VMEM (breaking point is 2x lower on
        # v7x's 64 MiB than on v5e/v6e's 128 MiB).
        raise NotImplementedError(
            "Weight set too large for the weight-resident kernel; a tiled "
            "fallback is required.")

    # ---------------- batch tile selection ----------------
    if batch <= 8:
        tb = batch                               # single full-extent block
    else:
        # At least 2 grid steps when batch is large enough, so the "parallel"
        # axis shards across both v7x TensorCores; cap at tile_b.
        tb = min(tile_b, _round_up(pl.cdiv(batch, 2), 8))
        tb = max(tb, 8)
        while tb > 8 and resident_bytes + per_step_bytes(tb) > vmem_budget_bytes:
            tb = max(8, _round_up(tb // 2, 8))
    n_steps = pl.cdiv(batch, tb)                 # ragged last block is masked

    vmem_limit = int(min(
        vmem_budget_bytes + (8 << 20),
        max(resident_bytes + per_step_bytes(tb) + (4 << 20), 16 << 20)))

    # Constant index_map -> weights/biases stay VMEM-resident across steps.
    resident = lambda a: pl.BlockSpec(a.shape, lambda i: (0, 0))

    flops = 2 * batch * (genre_size * hid + hid * hid2 + hid2 * hid + hid * genre_size)
    bytes_accessed = (itemsize * batch * genre_size        # x in
                      + 4 * batch * genre_size             # out
                      + itemsize * w_elems + 4 * b_elems)  # params (read once)
    cost = pl.CostEstimate(flops=flops, transcendentals=0,
                           bytes_accessed=bytes_accessed)

    return pl.pallas_call(
        _ae_kernel,
        out_shape=jax.ShapeDtypeStruct((batch, genre_size), jnp.float32),
        grid_spec=pltpu.PrefetchScalarGridSpec(
            num_scalar_prefetch=0,
            grid=(n_steps,),
            in_specs=[
                pl.BlockSpec((tb, genre_size), lambda i: (i, 0)),   # x streams
                resident(params["w0"]), resident(params["b0"]),
                resident(params["w1"]), resident(params["b1"]),
                resident(params["w2"]), resident(params["b2"]),
                resident(params["w3"]), resident(params["b3"]),
            ],
            out_specs=pl.BlockSpec((tb, genre_size), lambda i: (i, 0)),
        ),
        compiler_params=pltpu.CompilerParams(
            dimension_semantics=("parallel",),   # megacore shard on v7x
            vmem_limit_bytes=vmem_limit,
        ),
        cost_estimate=cost,
    )(x, params["w0"], params["b0"], params["w1"], params["b1"],
      params["w2"], params["b2"], params["w3"], params["b3"])


def init_params(key, genre_size, hid_dim):
    """Deterministic synthetic init (uniform like PyTorch's default range)."""
    hid_dim_2 = int(hid_dim / 2)
    dims = [(genre_size, hid_dim),   # hid_0
            (hid_dim, hid_dim_2),    # hid_1
            (hid_dim_2, hid_dim),    # hid_2
            (hid_dim, genre_size)]   # out
    params = {}
    for idx, (fan_in, fan_out) in enumerate(dims):
        key, kw, kb = jax.random.split(key, 3)
        bound = 1.0 / (fan_in ** 0.5)
        params[f"w{idx}"] = jax.random.uniform(
            kw, (fan_in, fan_out), jnp.float32, -bound, bound)
        params[f"b{idx}"] = jax.random.uniform(
            kb, (1, fan_out), jnp.float32, -bound, bound)
    return params


def _reference_forward(x, p):
    """Plain-JAX reference for sanity check."""
    h0 = x @ p["w0"] + p["b0"]
    g = jnp.maximum(h0 @ p["w1"] + p["b1"], 0.0)
    g = jnp.maximum(g @ p["w2"] + p["b2"], 0.0)
    g = g + h0
    return jnp.maximum(g @ p["w3"] + p["b3"], 0.0)


if __name__ == "__main__":
    batch = 2
    genre_size = 16
    hid_dim = 32

    key = jax.random.PRNGKey(0)
    key, kx = jax.random.split(key)
    x = jax.random.uniform(kx, (batch, genre_size), jnp.float32)
    params = init_params(key, genre_size, hid_dim)

    # One-time parameter prep (f32 compute path keeps exact f32 semantics;
    # pass compute_dtype=jnp.bfloat16 for the half-bandwidth MXU path).
    prepped = prepare_params(params, compute_dtype=jnp.float32)

    fwd = jax.jit(functools.partial(genres_ae_forward, tile_b=512))
    out = fwd(x, prepped)
    out = jax.block_until_ready(out)

    ref = _reference_forward(x, params)
    assert out.shape == (batch, genre_size)
    assert jnp.allclose(out, ref, atol=1e-5, rtol=1e-5)

    print("KERNEL_OK")
</pallas_src>

<mosaic_0001>
module attributes {stable_mosaic.version = 11 : i64} {
  func.func @_ae_kernel(%arg0: i32, %arg1: memref<2x16xf32, #tpu.memory_space<vmem>>, %arg2: memref<16x32xf32, #tpu.memory_space<vmem>>, %arg3: memref<1x32xf32, #tpu.memory_space<vmem>>, %arg4: memref<32x16xf32, #tpu.memory_space<vmem>>, %arg5: memref<1x16xf32, #tpu.memory_space<vmem>>, %arg6: memref<16x32xf32, #tpu.memory_space<vmem>>, %arg7: memref<1x32xf32, #tpu.memory_space<vmem>>, %arg8: memref<32x16xf32, #tpu.memory_space<vmem>>, %arg9: memref<1x16xf32, #tpu.memory_space<vmem>>, %arg10: memref<2x16xf32, #tpu.memory_space<vmem>>) attributes {dimension_semantics = [#tpu.dimension_semantics<parallel>], iteration_bounds = array<i64: 1>, scalar_prefetch = 0 : i64, scratch_operands = 0 : i64, tpu.core_type = #tpu.core_type<tc>, window_params = [{transform_indices = @transform_0, window_bounds = array<i64: 2, 16>}, {pipeline_mode = #tpu.pipeline_mode<synchronous>, transform_indices = @transform_1, window_bounds = array<i64: 16, 32>}, {pipeline_mode = #tpu.pipeline_mode<synchronous>, transform_indices = @transform_2, window_bounds = array<i64: 1, 32>}, {pipeline_mode = #tpu.pipeline_mode<synchronous>, transform_indices = @transform_3, window_bounds = array<i64: 32, 16>}, {pipeline_mode = #tpu.pipeline_mode<synchronous>, transform_indices = @transform_4, window_bounds = array<i64: 1, 16>}, {pipeline_mode = #tpu.pipeline_mode<synchronous>, transform_indices = @transform_5, window_bounds = array<i64: 16, 32>}, {pipeline_mode = #tpu.pipeline_mode<synchronous>, transform_indices = @transform_6, window_bounds = array<i64: 1, 32>}, {pipeline_mode = #tpu.pipeline_mode<synchronous>, transform_indices = @transform_7, window_bounds = array<i64: 32, 16>}, {pipeline_mode = #tpu.pipeline_mode<synchronous>, transform_indices = @transform_8, window_bounds = array<i64: 1, 16>}, {transform_indices = @transform_9, window_bounds = array<i64: 2, 16>}]} {
    %c0 = arith.constant 0 : index
    %c0_0 = arith.constant 0 : index
    %0 = vector.load %arg1[%c0, %c0_0] : memref<2x16xf32, #tpu.memory_space<vmem>>, vector<2x16xf32>
    %c0_1 = arith.constant 0 : index
    %c0_2 = arith.constant 0 : index
    %1 = vector.load %arg2[%c0_1, %c0_2] : memref<16x32xf32, #tpu.memory_space<vmem>>, vector<16x32xf32>
    %cst = arith.constant dense<0.000000e+00> : vector<2x32xf32>
    %2 = tpu.matmul %0, %1, %cst {dimension_numbers = #tpu.dot_dimension_numbers<[1], [0], [0], [1], [0, 0, 1, 1], [], []>} : vector<2x16xf32>, vector<16x32xf32>, vector<2x32xf32> -> vector<2x32xf32>
    %c0_3 = arith.constant 0 : index
    %c0_4 = arith.constant 0 : index
    %3 = vector.load %arg3[%c0_3, %c0_4] : memref<1x32xf32, #tpu.memory_space<vmem>>, vector<1x32xf32>
    %4 = vector.broadcast %3 : vector<1x32xf32> to vector<2x32xf32>
    %5 = arith.addf %2, %4 : vector<2x32xf32>
    %c0_5 = arith.constant 0 : index
    %c0_6 = arith.constant 0 : index
    %6 = vector.load %arg4[%c0_5, %c0_6] : memref<32x16xf32, #tpu.memory_space<vmem>>, vector<32x16xf32>
    %cst_7 = arith.constant dense<0.000000e+00> : vector<2x16xf32>
    %7 = tpu.matmul %5, %6, %cst_7 {dimension_numbers = #tpu.dot_dimension_numbers<[1], [0], [0], [1], [0, 0, 1, 1], [], []>} : vector<2x32xf32>, vector<32x16xf32>, vector<2x16xf32> -> vector<2x16xf32>
    %c0_8 = arith.constant 0 : index
    %c0_9 = arith.constant 0 : index
    %8 = vector.load %arg5[%c0_8, %c0_9] : memref<1x16xf32, #tpu.memory_space<vmem>>, vector<1x16xf32>
    %9 = vector.broadcast %8 : vector<1x16xf32> to vector<2x16xf32>
    %10 = arith.addf %7, %9 : vector<2x16xf32>
    %cst_10 = arith.constant 0.000000e+00 : f32
    %11 = vector.broadcast %cst_10 : f32 to vector<2x16xf32>
    %12 = arith.maximumf %10, %11 : vector<2x16xf32>
    %c0_11 = arith.constant 0 : index
    %c0_12 = arith.constant 0 : index
    %13 = vector.load %arg6[%c0_11, %c0_12] : memref<16x32xf32, #tpu.memory_space<vmem>>, vector<16x32xf32>
    %cst_13 = arith.constant dense<0.000000e+00> : vector<2x32xf32>
    %14 = tpu.matmul %12, %13, %cst_13 {dimension_numbers = #tpu.dot_dimension_numbers<[1], [0], [0], [1], [0, 0, 1, 1], [], []>} : vector<2x16xf32>, vector<16x32xf32>, vector<2x32xf32> -> vector<2x32xf32>
    %c0_14 = arith.constant 0 : index
    %c0_15 = arith.constant 0 : index
    %15 = vector.load %arg7[%c0_14, %c0_15] : memref<1x32xf32, #tpu.memory_space<vmem>>, vector<1x32xf32>
    %16 = vector.broadcast %15 : vector<1x32xf32> to vector<2x32xf32>
    %17 = arith.addf %14, %16 : vector<2x32xf32>
    %cst_16 = arith.constant 0.000000e+00 : f32
    %18 = vector.broadcast %cst_16 : f32 to vector<2x32xf32>
    %19 = arith.maximumf %17, %18 : vector<2x32xf32>
    %20 = arith.addf %19, %5 : vector<2x32xf32>
    %c0_17 = arith.constant 0 : index
    %c0_18 = arith.constant 0 : index
    %21 = vector.load %arg8[%c0_17, %c0_18] : memref<32x16xf32, #tpu.memory_space<vmem>>, vector<32x16xf32>
    %cst_19 = arith.constant dense<0.000000e+00> : vector<2x16xf32>
    %22 = tpu.matmul %20, %21, %cst_19 {dimension_numbers = #tpu.dot_dimension_numbers<[1], [0], [0], [1], [0, 0, 1, 1], [], []>} : vector<2x32xf32>, vector<32x16xf32>, vector<2x16xf32> -> vector<2x16xf32>
    %c0_20 = arith.constant 0 : index
    %c0_21 = arith.constant 0 : index
    %23 = vector.load %arg9[%c0_20, %c0_21] : memref<1x16xf32, #tpu.memory_space<vmem>>, vector<1x16xf32>
    %24 = vector.broadcast %23 : vector<1x16xf32> to vector<2x16xf32>
    %25 = arith.addf %22, %24 : vector<2x16xf32>
    %cst_22 = arith.constant 0.000000e+00 : f32
    %26 = vector.broadcast %cst_22 : f32 to vector<2x16xf32>
    %27 = arith.maximumf %25, %26 : vector<2x16xf32>
    %c0_23 = arith.constant 0 : index
    %c0_24 = arith.constant 0 : index
    %28 = vector.load %arg10[%c0_23, %c0_24] : memref<2x16xf32, #tpu.memory_space<vmem>>, vector<2x16xf32>
    tpu.vector_store %arg10[%c0_23, %c0_24], %27 {strides = array<i32>} : memref<2x16xf32, #tpu.memory_space<vmem>>, vector<2x16xf32>,
    return
  }
  func.func @transform_0(%arg0: i32) -> (i32, i32) {
    %c0_i32 = arith.constant 0 : i32
    %c0_i32_0 = arith.constant 0 : i32
    return %arg0, %c0_i32 : i32, i32
  }
  func.func @transform_1(%arg0: i32) -> (i32, i32) {
    %c0_i32 = arith.constant 0 : i32
    %c0_i32_0 = arith.constant 0 : i32
    %c0_i32_1 = arith.constant 0 : i32
    return %c0_i32, %c0_i32_0 : i32, i32
  }
  func.func @transform_2(%arg0: i32) -> (i32, i32) {
    %c0_i32 = arith.constant 0 : i32
    %c0_i32_0 = arith.constant 0 : i32
    %c0_i32_1 = arith.constant 0 : i32
    return %c0_i32, %c0_i32_0 : i32, i32
  }
  func.func @transform_3(%arg0: i32) -> (i32, i32) {
    %c0_i32 = arith.constant 0 : i32
    %c0_i32_0 = arith.constant 0 : i32
    %c0_i32_1 = arith.constant 0 : i32
    return %c0_i32, %c0_i32_0 : i32, i32
  }
  func.func @transform_4(%arg0: i32) -> (i32, i32) {
    %c0_i32 = arith.constant 0 : i32
    %c0_i32_0 = arith.constant 0 : i32
    %c0_i32_1 = arith.constant 0 : i32
    return %c0_i32, %c0_i32_0 : i32, i32
  }
  func.func @transform_5(%arg0: i32) -> (i32, i32) {
    %c0_i32 = arith.constant 0 : i32
    %c0_i32_0 = arith.constant 0 : i32
    %c0_i32_1 = arith.constant 0 : i32
    return %c0_i32, %c0_i32_0 : i32, i32
  }
  func.func @transform_6(%arg0: i32) -> (i32, i32) {
    %c0_i32 = arith.constant 0 : i32
    %c0_i32_0 = arith.constant 0 : i32
    %c0_i32_1 = arith.constant 0 : i32
    return %c0_i32, %c0_i32_0 : i32, i32
  }
  func.func @transform_7(%arg0: i32) -> (i32, i32) {
    %c0_i32 = arith.constant 0 : i32
    %c0_i32_0 = arith.constant 0 : i32
    %c0_i32_1 = arith.constant 0 : i32
    return %c0_i32, %c0_i32_0 : i32, i32
  }
  func.func @transform_8(%arg0: i32) -> (i32, i32) {
    %c0_i32 = arith.constant 0 : i32
    %c0_i32_0 = arith.constant 0 : i32
    %c0_i32_1 = arith.constant 0 : i32
    return %c0_i32, %c0_i32_0 : i32, i32
  }
  func.func @transform_9(%arg0: i32) -> (i32, i32) {
    %c0_i32 = arith.constant 0 : i32
    %c0_i32_0 = arith.constant 0 : i32
    return %arg0, %c0_i32 : i32, i32
  }
}

</mosaic_0001>

<bundles_post_ra>
// kernel: genres_ae_forward.1
= control target key start
LH: loop header
LB: loop body
LE: loop exit
PB: predicated region body
PF: predicated region fallthrough
CT: control target
= control target key end

     0   :  { %vm40_vm0 = vcmask 130048   ;;  %s322_s0 = inlined_call_operand.vmem [shape: f32[2,16], index: 0, kind: input, shape index: {}]   ;;  %s323_s1 = inlined_call_operand.vmem [shape: f32[16,32], index: 1, kind: input, shape index: {}]   ;;  %s324_s2 = inlined_call_operand.vmem [shape: f32[1,32], index: 2, kind: input, shape index: {}]   ;;  %s325_s3 = inlined_call_operand.vmem [shape: f32[32,16], index: 3, kind: input, shape index: {}]   ;;  %s326_s4 = inlined_call_operand.vmem [shape: f32[1,16], index: 4, kind: input, shape index: {}]   ;;  %s327_s5 = inlined_call_operand.vmem [shape: f32[16,32], index: 5, kind: input, shape index: {}]   ;;  %s328_s6 = inlined_call_operand.vmem [shape: f32[1,32], index: 6, kind: input, shape index: {}]   ;;  %s329_s7 = inlined_call_operand.vmem [shape: f32[32,16], index: 7, kind: input, shape index: {}]   ;;  %s330_s8 = inlined_call_operand.vmem [shape: f32[1,16], index: 8, kind: input, shape index: {}]   ;;  %s331_s9 = inlined_call_operand.hbm [shape: f32[2,16], index: 9, kind: output, shape index: {}]  }
   0x1   :  { %v35_v0 = vld [vmem:[%s323_s1 + $0x8] sm:$0xff]  ;;  %v34_v1 = vld [vmem:[%s323_s1] sm:$0xff]  ;;  %v67_v3 = vld [vmem:[%s325_s3 + $0x18] sm:$0xff] }
   0x2   :  { %v33_v2 = vld [vmem:[%s322_s0] sm:$0x3]  ;;  %58 = vmatpush.msra.mxu0 %v35_v0  ;;  %v66_v4 = vld [vmem:[%s325_s3 + $0x10] sm:$0xff]  ;;  %88 = vmatpush.msra.mxu1 %v67_v3 }
   0x4   :  { %59 = vmatpush.msra.mxu0 %v34_v1 }
   0x5   :  { %14 = vsyncpa [#allocation3], 0  ;;  %178 = vmatmul.msk.f32.vlgmr.msra.gmra.mxu0 %vm40_vm0, %v33_v2  ;;  %89 = vmatpush.msra.mxu1 %v66_v4  ;;  %v65_v5 = vld [vmem:[%s325_s3 + $0x8] sm:$0xff]  ;;  %v64_v6 = vld [vmem:[%s325_s3] sm:$0xff]  ;;  %vm72_vm1 = vcmask 261120   ;;  %s213_s16 = smov [#allocation2]  }
   0x6   :  { %v183_v7 = vld [vmem:[%s324_s2] ss:$0 sm:$0xff]  ;;  %v98_v10 = vld [vmem:[%s327_s5 + $0x8] sm:$0xff]  ;;  %v131_v16 = vld [vmem:[%s329_s7 + $0x18] sm:$0xff]  ;;  %s167_s17 = sshll.u32 %s213_s16, 4  ;;  %s169_s1 = sshll.u32 %s331_s9, 4  ;;  %s168_s17 = int_to_ptr.vmem [resolvable:$true] %s167_s17  ;;  %s170_s1 = int_to_ptr.hbm [resolvable:$true] %s169_s1 }
   0x7   :  { %90 = vmatpush.msra.mxu1 %v65_v5  ;;  %120 = vmatpush.msra.mxu2 %v98_v10  ;;  %v97_v11 = vld [vmem:[%s327_s5] sm:$0xff]  ;;  %v130_v17 = vld [vmem:[%s329_s7 + $0x10] sm:$0xff]  ;;  %v129_v18 = vld [vmem:[%s329_s7 + $0x8] sm:$0xff]  ;;  %vm160_vm2 = vcmask 123904  }
   0x8   :  { %v184_v12 = vld [vmem:[%s326_s4] ss:$0 sm:$0xff]  ;;  %151 = vmatpush.msra.mxu3 %v131_v16 }
   0x9   :  { %91 = vmatpush.msra.mxu1 %v64_v6  ;;  %121 = vmatpush.msra.mxu2 %v97_v11  ;;  %v128_v19 = vld [vmem:[%s329_s7] sm:$0xff] }
   0xa   :  { %152 = vmatpush.msra.mxu3 %v130_v17  ;;  %v185_v20 = vld [vmem:[%s328_s6] ss:$0 sm:$0xff] }
   0xb   :  { %v186_v25 = vld [vmem:[%s330_s8] ss:$0 sm:$0xff] }
   0xc   :  { %153 = vmatpush.msra.mxu3 %v129_v18 }
   0xe   :  { %154 = vmatpush.msra.mxu3 %v128_v19 }
  0x82   :  { %v61_v8 = vpop.f32.mrf.mxu0 }
  0x83   :  { %v62_v9 = vadd.f32 %v183_v7, %v61_v8 }
  0x85   :  { %179 = vmatmul.msk.f32.vlgmr.msra.gmra.mxu1 %vm72_vm1, %v62_v9 }
 0x102   :  { %v93_v13 = vpop.f32.mrf.mxu1 }
 0x103   :  { %v94_v14 = vadd.f32 %v184_v12, %v93_v13 }
 0x105   :  { %v96_v15 = vmax.f32 %v94_v14, 0.0 }
 0x107   :  { %180 = vmatmul.msk.f32.vlgmr.msra.gmra.mxu2 %vm40_vm0, %v96_v15 }
 0x18a   :  { %v123_v21 = vpop.f32.mrf.mxu2 }
 0x18b   :  { %v124_v22 = vadd.f32 %v185_v20, %v123_v21 }
 0x18d   :  { %v126_v23 = vmax.f32 %v124_v22, 0.0 }
 0x18f   :  { %v127_v24 = vadd.f32 %v126_v23, %v62_v9 }
 0x191   :  { %181 = vmatmul.msk.f32.vlgmr.msra.gmra.mxu3 %vm72_vm1, %v127_v24 }
 0x214   :  { %v156_v26 = vpop.f32.mrf.mxu3 }
 0x215   :  { %v157_v27 = vadd.f32 %v186_v25, %v156_v26 }
 0x217   :  { %v159_v28 = vmax.f32 %v157_v27, 0.0 }
 0x219   :  { %161 = vst.msk [vmem:[#allocation2] sm:$0x3] %vm160_vm2, %v159_v28 }
 0x21a   :  { %172 = dma.vmem_to_hbm [thread:$0]  %s168_s17, 32, %s170_s1, [#allocation3]  }
 0x21b   :  { %211 = dma.done.wait [#allocation3], 32  }
 0x21c   :  { %212 = vsyncadd [#allocation3], 4294967264 }
 0x21d   :  { %177 = vsyncpa [#allocation3], 1 }

</bundles_post_ra>
